<compile_context>
chip_gen: v6e
topology: v6e:2x2x1
jax: 0.10.0
libtpu: 0.0.40
codegen_flags: <defaults>
</compile_context>

<pallas_src>
import jax
import jax.numpy as jnp
from jax.experimental import pallas as pl
from jax.experimental.pallas import tpu as pltpu

# ----------------------------- config (small) --------------------------------
KEYBOARD_KEYS = ['w', 'a', 's', 'd', 'q', 'e', 'r', 'f', 'space', 'shift',
                 'ctrl', 'tab', 'esc', 'enter', '1', '2', '3', '4', '5']
EMBED_DIM = 128            # config['embedding_dim'] (small, lane-aligned)
HIDDEN_DIM = 256           # config['hidden_dim']
POS_HIDDEN = 256           # hard-coded 256 in mouse_position_head
NUM_KB_ACTIONS = len(KEYBOARD_KEYS) * 2        # 38
NUM_MOUSE_ACTIONS = 4                          # 4
POS_OFF = NUM_KB_ACTIONS + NUM_MOUSE_ACTIONS   # 42 (lane offset of position)
OUT_PAD = 128                                  # packed output slab width
HEADS_PAD = OUT_PAD + POS_HIDDEN               # 384: fused-heads matmul width
MOUSE_ACTION_NAMES = ['move', 'left_click', 'right_click', 'scroll']
MAX_TILE_B = 1024
NEG_BIG = -1e30


def _gelu_tanh(x):
    # tanh-approximate GELU: single EUP transcendental per element instead of
    # the long VPU erf polynomial.  ~1e-3 deviation from nn.GELU() exact erf.
    c = 0.7978845608028654  # sqrt(2/pi)
    return 0.5 * x * (1.0 + jnp.tanh(c * (x + 0.044715 * x * x * x)))


# ------------------------------- Pallas kernel --------------------------------
def action_model_kernel(x_ref, w1_ref, b1_ref, w2_ref, b2_ref,
                        wh_ref, bh_ref, wp2_ref, bp2_ref, out_ref):
    x = x_ref[...].astype(jnp.bfloat16)                          # f32 load, bf16 matmul input

    # shared_layers: Linear -> GELU -> Linear -> GELU   (activations in f32)
    h = _gelu_tanh(jnp.dot(x, w1_ref[...],
                           preferred_element_type=jnp.float32) + b1_ref[...])
    feat = _gelu_tanh(jnp.dot(h.astype(jnp.bfloat16), w2_ref[...],
                              preferred_element_type=jnp.float32) + b2_ref[...])

    # fused heads: [keyboard(38) | mouse_action(4) | pad | mouse_pos hidden(256)]
    heads = jnp.dot(feat.astype(jnp.bfloat16), wh_ref[...],
                    preferred_element_type=jnp.float32) + bh_ref[...]   # (tb, 384)

    logits = heads[:, :OUT_PAD]                       # lane-aligned slice (tb, 128)
    lane = jax.lax.broadcasted_iota(jnp.int32, logits.shape, 1)
    kb_mask = lane < NUM_KB_ACTIONS                    # lanes 0:38
    ma_mask = (lane >= NUM_KB_ACTIONS) & (lane < POS_OFF)  # lanes 38:42

    # fused dual masked softmax: one exp pass, two masked sums
    kb_max = jnp.max(jnp.where(kb_mask, logits, NEG_BIG), axis=-1, keepdims=True)
    ma_max = jnp.max(jnp.where(ma_mask, logits, NEG_BIG), axis=-1, keepdims=True)
    group_max = jnp.where(kb_mask, kb_max, ma_max)
    shifted = jnp.where(kb_mask | ma_mask, logits - group_max, NEG_BIG)
    e = jnp.exp(shifted)                               # zero outside lanes 0:42
    kb_sum = jnp.sum(jnp.where(kb_mask, e, 0.0), axis=-1, keepdims=True)
    ma_sum = jnp.sum(jnp.where(ma_mask, e, 0.0), axis=-1, keepdims=True)
    inv = jnp.where(kb_mask,
                    pl.reciprocal(kb_sum, approx=True),
                    pl.reciprocal(ma_sum, approx=True))
    probs = e * inv                                    # kb probs @ 0:38, ma probs @ 38:42

    # mouse_position_head tail: GELU -> Linear(256->2, padded to 128) -> sigmoid
    # (kept on the MXU on all gens; the zero-column waste only matters on v5e)
    p_hidden = _gelu_tanh(heads[:, OUT_PAD:HEADS_PAD])             # (tb, 256)
    pos_logits = jnp.dot(p_hidden.astype(jnp.bfloat16), wp2_ref[...],
                         preferred_element_type=jnp.float32) + bp2_ref[...]
    pos_vals = jnp.where((lane >= POS_OFF) & (lane < POS_OFF + 2),
                         jax.nn.sigmoid(pos_logits), 0.0)          # lanes 42:44

    # single lane-dense output slab: kb[0:38] + ma[38:42] + pos[42:44]
    out_ref[...] = probs + pos_vals


# --------------------------------- wrapper ------------------------------------
def _cdiv(a, b):
    return (a + b - 1) // b


def _round_up(n, m):
    return ((n + m - 1) // m) * m


def pack_params(p):
    """Fuse head weights into lane-aligned slabs; cast matmul weights to bf16."""
    wh = jnp.zeros((HIDDEN_DIM, HEADS_PAD), jnp.float32)
    wh = wh.at[:, :NUM_KB_ACTIONS].set(p['wk'])
    wh = wh.at[:, NUM_KB_ACTIONS:POS_OFF].set(p['wm'])
    wh = wh.at[:, OUT_PAD:HEADS_PAD].set(p['wp1'])
    bh = jnp.zeros((1, HEADS_PAD), jnp.float32)
    bh = bh.at[:, :NUM_KB_ACTIONS].set(p['bk'])
    bh = bh.at[:, NUM_KB_ACTIONS:POS_OFF].set(p['bm'])
    bh = bh.at[:, OUT_PAD:HEADS_PAD].set(p['bp1'])
    wp2 = jnp.zeros((POS_HIDDEN, OUT_PAD), jnp.float32)
    wp2 = wp2.at[:, POS_OFF:POS_OFF + 2].set(p['wp2'])
    bp2 = jnp.zeros((1, OUT_PAD), jnp.float32)
    bp2 = bp2.at[:, POS_OFF:POS_OFF + 2].set(p['bp2'])
    return dict(
        w1=p['w1'].astype(jnp.bfloat16), b1=p['b1'],
        w2=p['w2'].astype(jnp.bfloat16), b2=p['b2'],
        wh=wh.astype(jnp.bfloat16), bh=bh,
        wp2=wp2.astype(jnp.bfloat16), bp2=bp2)


def action_model_forward(x, packed):
    """x: (B, EMBED_DIM) f32. Returns (keyboard_probs, mouse_action_probs, mouse_position)."""
    B = x.shape[0]
    # Padding-aware, balanced tile sizing.  Force >= 2 grid steps for B >= 64
    # so the "parallel" axis engages both v7x TensorCores (harmless elsewhere).
    min_tiles = 2 if B >= 64 else 1
    n_tiles = max(_cdiv(B, MAX_TILE_B), min_tiles)
    tile_b = _round_up(_cdiv(B, n_tiles), 16)
    B_pad = n_tiles * tile_b
    if B_pad != B:
        x = jnp.pad(x, ((0, B_pad - B), (0, 0)))

    full = lambda shape: pl.BlockSpec(shape, lambda i: (0, 0))   # VMEM-resident weights
    grid_spec = pltpu.PrefetchScalarGridSpec(
        num_scalar_prefetch=0,
        grid=(n_tiles,),
        in_specs=[
            pl.BlockSpec((tile_b, EMBED_DIM), lambda i: (i, 0)),    # x tile (f32)
            full((EMBED_DIM, HIDDEN_DIM)), full((1, HIDDEN_DIM)),   # w1, b1
            full((HIDDEN_DIM, HIDDEN_DIM)), full((1, HIDDEN_DIM)),  # w2, b2
            full((HIDDEN_DIM, HEADS_PAD)), full((1, HEADS_PAD)),    # fused heads w, b
            full((POS_HIDDEN, OUT_PAD)), full((1, OUT_PAD)),        # padded wp2, bp2
        ],
        out_specs=pl.BlockSpec((tile_b, OUT_PAD), lambda i: (i, 0)),
    )
    out = pl.pallas_call(
        action_model_kernel,
        out_shape=jax.ShapeDtypeStruct((B_pad, OUT_PAD), jnp.float32),
        grid_spec=grid_spec,
        compiler_params=pltpu.CompilerParams(
            dimension_semantics=("parallel",),
            vmem_limit_bytes=32 * 1024 * 1024),   # covers tile_b=1024 f32 intermediates on v5e
    )(x, packed['w1'], packed['b1'], packed['w2'], packed['b2'],
      packed['wh'], packed['bh'], packed['wp2'], packed['bp2'])

    kb = out[:B, :NUM_KB_ACTIONS]
    ma = out[:B, NUM_KB_ACTIONS:POS_OFF]
    pos = out[:B, POS_OFF:POS_OFF + 2]
    return kb, ma, pos


# ------------------------- deterministic parameter init -----------------------
def init_params(key):
    def dense(k, fan_in, fan_out):
        kw, kb = jax.random.split(k)
        w = jax.random.normal(kw, (fan_in, fan_out), jnp.float32) * 0.02
        b = jax.random.normal(kb, (1, fan_out), jnp.float32) * 0.02
        return w, b

    ks = jax.random.split(key, 6)
    w1, b1 = dense(ks[0], EMBED_DIM, HIDDEN_DIM)
    w2, b2 = dense(ks[1], HIDDEN_DIM, HIDDEN_DIM)
    wk, bk = dense(ks[2], HIDDEN_DIM, NUM_KB_ACTIONS)
    wm, bm = dense(ks[3], HIDDEN_DIM, NUM_MOUSE_ACTIONS)
    wp1, bp1 = dense(ks[4], HIDDEN_DIM, POS_HIDDEN)
    wp2, bp2 = dense(ks[5], POS_HIDDEN, 2)
    return dict(w1=w1, b1=b1, w2=w2, b2=b2, wk=wk, bk=bk, wm=wm, bm=bm,
                wp1=wp1, bp1=bp1, wp2=wp2, bp2=bp2)


# pure-JAX reference (mirrors the PyTorch forward: exact-erf GELU, f32)
def reference_forward(x, p):
    gelu = lambda v: jax.nn.gelu(v, approximate=False)
    h = gelu(x @ p['w1'] + p['b1'])
    feat = gelu(h @ p['w2'] + p['b2'])
    kb = jax.nn.softmax(feat @ p['wk'] + p['bk'], axis=-1)
    ma = jax.nn.softmax(feat @ p['wm'] + p['bm'], axis=-1)
    pos = jax.nn.sigmoid(gelu(feat @ p['wp1'] + p['bp1']) @ p['wp2'] + p['bp2'])
    return kb, ma, pos


def build_action_plan(kb_probs_row, ma_probs_row, pos_row):
    """Host-side glue mirroring the PyTorch .item()/dict construction."""
    # TODO(synk): argmax/.item()/dict construction stays on host — no Pallas equivalent.
    keyboard_action = int(jnp.argmax(kb_probs_row))
    mouse_action = int(jnp.argmax(ma_probs_row))
    plan = []
    key_idx = keyboard_action // 2
    is_press = keyboard_action % 2 == 0
    plan.append({'type': 'keyboard', 'key': KEYBOARD_KEYS[key_idx],
                 'action': 'press' if is_press else 'release'})
    name = MOUSE_ACTION_NAMES[mouse_action]
    if name == 'move':
        px, py = [float(v) for v in pos_row]
        plan.append({'type': 'mouse', 'action': 'move', 'position': {'x': px, 'y': py}})
    else:
        plan.append({'type': 'mouse', 'action': name})
    return plan


if __name__ == "__main__":
    key = jax.random.PRNGKey(0)
    k_params, k_x, k_x2 = jax.random.split(key, 3)
    params = init_params(k_params)
    packed = pack_params(params)

    # small-batch check (mirrors the PyTorch forward's effective batch of 1-2)
    B = 2
    x = jax.random.normal(k_x, (B, EMBED_DIM), jnp.float32)
    kb_probs, ma_probs, mouse_pos = jax.block_until_ready(
        action_model_forward(x, packed))

    kb_ref, ma_ref, pos_ref = reference_forward(x, params)
    # bf16 matmul inputs + tanh-approx GELU + approx reciprocal -> loosened tolerance
    assert jnp.allclose(kb_probs, kb_ref, atol=2e-2), "keyboard probs mismatch"
    assert jnp.allclose(ma_probs, ma_ref, atol=2e-2), "mouse action probs mismatch"
    assert jnp.allclose(mouse_pos, pos_ref, atol=2e-2), "mouse position mismatch"

    # larger batch exercises the multi-tile grid and padding-aware tile sizing
    # (B=300 -> 2 tiles of 160 rows, 320 padded rows total)
    B2 = 300
    x2 = jax.random.normal(k_x2, (B2, EMBED_DIM), jnp.float32)
    kb2, ma2, pos2 = jax.block_until_ready(action_model_forward(x2, packed))
    kb2_ref, ma2_ref, pos2_ref = reference_forward(x2, params)
    assert jnp.allclose(kb2, kb2_ref, atol=2e-2), "batched keyboard probs mismatch"
    assert jnp.allclose(ma2, ma2_ref, atol=2e-2), "batched mouse action probs mismatch"
    assert jnp.allclose(pos2, pos2_ref, atol=2e-2), "batched mouse position mismatch"

    _ = build_action_plan(kb_probs[0], ma_probs[0], mouse_pos[0])

    print("KERNEL_OK")
</pallas_src>

<mosaic_0001>
module attributes {stable_mosaic.version = 11 : i64} {
  func.func @action_model_kernel(%arg0: i32, %arg1: memref<16x128xf32, #tpu.memory_space<vmem>>, %arg2: memref<128x256xbf16, #tpu.memory_space<vmem>>, %arg3: memref<1x256xf32, #tpu.memory_space<vmem>>, %arg4: memref<256x256xbf16, #tpu.memory_space<vmem>>, %arg5: memref<1x256xf32, #tpu.memory_space<vmem>>, %arg6: memref<256x384xbf16, #tpu.memory_space<vmem>>, %arg7: memref<1x384xf32, #tpu.memory_space<vmem>>, %arg8: memref<256x128xbf16, #tpu.memory_space<vmem>>, %arg9: memref<1x128xf32, #tpu.memory_space<vmem>>, %arg10: memref<16x128xf32, #tpu.memory_space<vmem>>) attributes {dimension_semantics = [#tpu.dimension_semantics<parallel>], iteration_bounds = array<i64: 1>, scalar_prefetch = 0 : i64, scratch_operands = 0 : i64, tpu.core_type = #tpu.core_type<tc>, window_params = [{transform_indices = @transform_0, window_bounds = array<i64: 16, 128>}, {pipeline_mode = #tpu.pipeline_mode<synchronous>, transform_indices = @transform_1, window_bounds = array<i64: 128, 256>}, {pipeline_mode = #tpu.pipeline_mode<synchronous>, transform_indices = @transform_2, window_bounds = array<i64: 1, 256>}, {pipeline_mode = #tpu.pipeline_mode<synchronous>, transform_indices = @transform_3, window_bounds = array<i64: 256, 256>}, {pipeline_mode = #tpu.pipeline_mode<synchronous>, transform_indices = @transform_4, window_bounds = array<i64: 1, 256>}, {pipeline_mode = #tpu.pipeline_mode<synchronous>, transform_indices = @transform_5, window_bounds = array<i64: 256, 384>}, {pipeline_mode = #tpu.pipeline_mode<synchronous>, transform_indices = @transform_6, window_bounds = array<i64: 1, 384>}, {pipeline_mode = #tpu.pipeline_mode<synchronous>, transform_indices = @transform_7, window_bounds = array<i64: 256, 128>}, {pipeline_mode = #tpu.pipeline_mode<synchronous>, transform_indices = @transform_8, window_bounds = array<i64: 1, 128>}, {transform_indices = @transform_9, window_bounds = array<i64: 16, 128>}]} {
    %c0 = arith.constant 0 : index
    %c0_0 = arith.constant 0 : index
    %0 = vector.load %arg1[%c0, %c0_0] : memref<16x128xf32, #tpu.memory_space<vmem>>, vector<16x128xf32>
    %1 = arith.truncf %0 : vector<16x128xf32> to vector<16x128xbf16>
    %c0_1 = arith.constant 0 : index
    %c0_2 = arith.constant 0 : index
    %2 = vector.load %arg2[%c0_1, %c0_2] : memref<128x256xbf16, #tpu.memory_space<vmem>>, vector<128x256xbf16>
    %cst = arith.constant dense<0.000000e+00> : vector<16x256xf32>
    %3 = tpu.matmul %1, %2, %cst {dimension_numbers = #tpu.dot_dimension_numbers<[1], [0], [0], [1], [0, 0, 1, 1], [], []>} : vector<16x128xbf16>, vector<128x256xbf16>, vector<16x256xf32> -> vector<16x256xf32>
    %c0_3 = arith.constant 0 : index
    %c0_4 = arith.constant 0 : index
    %4 = vector.load %arg3[%c0_3, %c0_4] : memref<1x256xf32, #tpu.memory_space<vmem>>, vector<1x256xf32>
    %5 = vector.broadcast %4 : vector<1x256xf32> to vector<16x256xf32>
    %6 = arith.addf %3, %5 : vector<16x256xf32>
    %cst_5 = arith.constant 5.000000e-01 : f32
    %7 = vector.broadcast %cst_5 : f32 to vector<16x256xf32>
    %8 = arith.mulf %7, %6 : vector<16x256xf32>
    %cst_6 = arith.constant 4.471500e-02 : f32
    %9 = vector.broadcast %cst_6 : f32 to vector<16x256xf32>
    %10 = arith.mulf %9, %6 : vector<16x256xf32>
    %11 = arith.mulf %10, %6 : vector<16x256xf32>
    %12 = arith.mulf %11, %6 : vector<16x256xf32>
    %13 = arith.addf %6, %12 : vector<16x256xf32>
    %cst_7 = arith.constant 0.797884583 : f32
    %14 = vector.broadcast %cst_7 : f32 to vector<16x256xf32>
    %15 = arith.mulf %14, %13 : vector<16x256xf32>
    %16 = math.tanh %15 : vector<16x256xf32>
    %cst_8 = arith.constant 1.000000e+00 : f32
    %17 = vector.broadcast %cst_8 : f32 to vector<16x256xf32>
    %18 = arith.addf %17, %16 : vector<16x256xf32>
    %19 = arith.mulf %8, %18 : vector<16x256xf32>
    %20 = arith.truncf %19 : vector<16x256xf32> to vector<16x256xbf16>
    %c0_9 = arith.constant 0 : index
    %c0_10 = arith.constant 0 : index
    %21 = vector.load %arg4[%c0_9, %c0_10] : memref<256x256xbf16, #tpu.memory_space<vmem>>, vector<256x256xbf16>
    %cst_11 = arith.constant dense<0.000000e+00> : vector<16x256xf32>
    %22 = tpu.matmul %20, %21, %cst_11 {dimension_numbers = #tpu.dot_dimension_numbers<[1], [0], [0], [1], [0, 0, 1, 1], [], []>} : vector<16x256xbf16>, vector<256x256xbf16>, vector<16x256xf32> -> vector<16x256xf32>
    %c0_12 = arith.constant 0 : index
    %c0_13 = arith.constant 0 : index
    %23 = vector.load %arg5[%c0_12, %c0_13] : memref<1x256xf32, #tpu.memory_space<vmem>>, vector<1x256xf32>
    %24 = vector.broadcast %23 : vector<1x256xf32> to vector<16x256xf32>
    %25 = arith.addf %22, %24 : vector<16x256xf32>
    %cst_14 = arith.constant 5.000000e-01 : f32
    %26 = vector.broadcast %cst_14 : f32 to vector<16x256xf32>
    %27 = arith.mulf %26, %25 : vector<16x256xf32>
    %cst_15 = arith.constant 4.471500e-02 : f32
    %28 = vector.broadcast %cst_15 : f32 to vector<16x256xf32>
    %29 = arith.mulf %28, %25 : vector<16x256xf32>
    %30 = arith.mulf %29, %25 : vector<16x256xf32>
    %31 = arith.mulf %30, %25 : vector<16x256xf32>
    %32 = arith.addf %25, %31 : vector<16x256xf32>
    %cst_16 = arith.constant 0.797884583 : f32
    %33 = vector.broadcast %cst_16 : f32 to vector<16x256xf32>
    %34 = arith.mulf %33, %32 : vector<16x256xf32>
    %35 = math.tanh %34 : vector<16x256xf32>
    %cst_17 = arith.constant 1.000000e+00 : f32
    %36 = vector.broadcast %cst_17 : f32 to vector<16x256xf32>
    %37 = arith.addf %36, %35 : vector<16x256xf32>
    %38 = arith.mulf %27, %37 : vector<16x256xf32>
    %39 = arith.truncf %38 : vector<16x256xf32> to vector<16x256xbf16>
    %c0_18 = arith.constant 0 : index
    %c0_19 = arith.constant 0 : index
    %40 = vector.load %arg6[%c0_18, %c0_19] : memref<256x384xbf16, #tpu.memory_space<vmem>>, vector<256x384xbf16>
    %cst_20 = arith.constant dense<0.000000e+00> : vector<16x384xf32>
    %41 = tpu.matmul %39, %40, %cst_20 {dimension_numbers = #tpu.dot_dimension_numbers<[1], [0], [0], [1], [0, 0, 1, 1], [], []>} : vector<16x256xbf16>, vector<256x384xbf16>, vector<16x384xf32> -> vector<16x384xf32>
    %c0_21 = arith.constant 0 : index
    %c0_22 = arith.constant 0 : index
    %42 = vector.load %arg7[%c0_21, %c0_22] : memref<1x384xf32, #tpu.memory_space<vmem>>, vector<1x384xf32>
    %43 = vector.broadcast %42 : vector<1x384xf32> to vector<16x384xf32>
    %44 = arith.addf %41, %43 : vector<16x384xf32>
    %45 = vector.extract_strided_slice %44 {offsets = [0, 0], sizes = [16, 128], strides = [1, 1]} : vector<16x384xf32> to vector<16x128xf32>
    %46 = tpu.iota {dimensions = array<i32: 1>} : vector<16x128xi32>
    %c38_i32 = arith.constant 38 : i32
    %47 = vector.broadcast %c38_i32 : i32 to vector<16x128xi32>
    %48 = arith.cmpi slt, %46, %47 : vector<16x128xi32>
    %c38_i32_23 = arith.constant 38 : i32
    %49 = vector.broadcast %c38_i32_23 : i32 to vector<16x128xi32>
    %50 = arith.cmpi sge, %46, %49 : vector<16x128xi32>
    %c42_i32 = arith.constant 42 : i32
    %51 = vector.broadcast %c42_i32 : i32 to vector<16x128xi32>
    %52 = arith.cmpi slt, %46, %51 : vector<16x128xi32>
    %53 = arith.andi %50, %52 : vector<16x128xi1>
    %cst_24 = arith.constant -1.000000e+30 : f32
    %54 = vector.broadcast %cst_24 : f32 to vector<16x128xf32>
    %55 = arith.select %48, %45, %54 : vector<16x128xi1>, vector<16x128xf32>
    %cst_25 = arith.constant dense<0xFF800000> : vector<16xf32>
    %56 = vector.multi_reduction <maximumf>, %55, %cst_25 [1] : vector<16x128xf32> to vector<16xf32>
    %57 = vector.shape_cast %56 : vector<16xf32> to vector<16x1xf32>
    %cst_26 = arith.constant -1.000000e+30 : f32
    %58 = vector.broadcast %cst_26 : f32 to vector<16x128xf32>
    %59 = arith.select %53, %45, %58 : vector<16x128xi1>, vector<16x128xf32>
    %cst_27 = arith.constant dense<0xFF800000> : vector<16xf32>
    %60 = vector.multi_reduction <maximumf>, %59, %cst_27 [1] : vector<16x128xf32> to vector<16xf32>
    %61 = vector.shape_cast %60 : vector<16xf32> to vector<16x1xf32>
    %62 = vector.shape_cast %57 : vector<16x1xf32> to vector<16x1xf32>
    %63 = vector.broadcast %62 : vector<16x1xf32> to vector<16x128xf32>
    %64 = vector.shape_cast %61 : vector<16x1xf32> to vector<16x1xf32>
    %65 = vector.broadcast %64 : vector<16x1xf32> to vector<16x128xf32>
    %66 = arith.select %48, %63, %65 : vector<16x128xi1>, vector<16x128xf32>
    %67 = arith.ori %48, %53 : vector<16x128xi1>
    %68 = arith.subf %45, %66 : vector<16x128xf32>
    %cst_28 = arith.constant -1.000000e+30 : f32
    %69 = vector.broadcast %cst_28 : f32 to vector<16x128xf32>
    %70 = arith.select %67, %68, %69 : vector<16x128xi1>, vector<16x128xf32>
    %71 = math.exp %70 : vector<16x128xf32>
    %cst_29 = arith.constant 0.000000e+00 : f32
    %72 = vector.broadcast %cst_29 : f32 to vector<16x128xf32>
    %73 = arith.select %48, %71, %72 : vector<16x128xi1>, vector<16x128xf32>
    %cst_30 = arith.constant dense<0.000000e+00> : vector<16xf32>
    %74 = vector.multi_reduction <add>, %73, %cst_30 [1] : vector<16x128xf32> to vector<16xf32>
    %75 = vector.shape_cast %74 : vector<16xf32> to vector<16x1xf32>
    %cst_31 = arith.constant 0.000000e+00 : f32
    %76 = vector.broadcast %cst_31 : f32 to vector<16x128xf32>
    %77 = arith.select %53, %71, %76 : vector<16x128xi1>, vector<16x128xf32>
    %cst_32 = arith.constant dense<0.000000e+00> : vector<16xf32>
    %78 = vector.multi_reduction <add>, %77, %cst_32 [1] : vector<16x128xf32> to vector<16xf32>
    %79 = vector.shape_cast %78 : vector<16xf32> to vector<16x1xf32>
    %80 = tpu.reciprocal %75 {approx = true} : vector<16x1xf32> -> vector<16x1xf32>
    %81 = tpu.reciprocal %79 {approx = true} : vector<16x1xf32> -> vector<16x1xf32>
    %82 = vector.shape_cast %80 : vector<16x1xf32> to vector<16x1xf32>
    %83 = vector.broadcast %82 : vector<16x1xf32> to vector<16x128xf32>
    %84 = vector.shape_cast %81 : vector<16x1xf32> to vector<16x1xf32>
    %85 = vector.broadcast %84 : vector<16x1xf32> to vector<16x128xf32>
    %86 = arith.select %48, %83, %85 : vector<16x128xi1>, vector<16x128xf32>
    %87 = arith.mulf %71, %86 : vector<16x128xf32>
    %88 = vector.extract_strided_slice %44 {offsets = [0, 128], sizes = [16, 256], strides = [1, 1]} : vector<16x384xf32> to vector<16x256xf32>
    %cst_33 = arith.constant 5.000000e-01 : f32
    %89 = vector.broadcast %cst_33 : f32 to vector<16x256xf32>
    %90 = arith.mulf %89, %88 : vector<16x256xf32>
    %cst_34 = arith.constant 4.471500e-02 : f32
    %91 = vector.broadcast %cst_34 : f32 to vector<16x256xf32>
    %92 = arith.mulf %91, %88 : vector<16x256xf32>
    %93 = arith.mulf %92, %88 : vector<16x256xf32>
    %94 = arith.mulf %93, %88 : vector<16x256xf32>
    %95 = arith.addf %88, %94 : vector<16x256xf32>
    %cst_35 = arith.constant 0.797884583 : f32
    %96 = vector.broadcast %cst_35 : f32 to vector<16x256xf32>
    %97 = arith.mulf %96, %95 : vector<16x256xf32>
    %98 = math.tanh %97 : vector<16x256xf32>
    %cst_36 = arith.constant 1.000000e+00 : f32
    %99 = vector.broadcast %cst_36 : f32 to vector<16x256xf32>
    %100 = arith.addf %99, %98 : vector<16x256xf32>
    %101 = arith.mulf %90, %100 : vector<16x256xf32>
    %102 = arith.truncf %101 : vector<16x256xf32> to vector<16x256xbf16>
    %c0_37 = arith.constant 0 : index
    %c0_38 = arith.constant 0 : index
    %103 = vector.load %arg8[%c0_37, %c0_38] : memref<256x128xbf16, #tpu.memory_space<vmem>>, vector<256x128xbf16>
    %cst_39 = arith.constant dense<0.000000e+00> : vector<16x128xf32>
    %104 = tpu.matmul %102, %103, %cst_39 {dimension_numbers = #tpu.dot_dimension_numbers<[1], [0], [0], [1], [0, 0, 1, 1], [], []>} : vector<16x256xbf16>, vector<256x128xbf16>, vector<16x128xf32> -> vector<16x128xf32>
    %c0_40 = arith.constant 0 : index
    %c0_41 = arith.constant 0 : index
    %105 = vector.load %arg9[%c0_40, %c0_41] : memref<1x128xf32, #tpu.memory_space<vmem>>, vector<1x128xf32>
    %106 = vector.broadcast %105 : vector<1x128xf32> to vector<16x128xf32>
    %107 = arith.addf %104, %106 : vector<16x128xf32>
    %c42_i32_42 = arith.constant 42 : i32
    %108 = vector.broadcast %c42_i32_42 : i32 to vector<16x128xi32>
    %109 = arith.cmpi sge, %46, %108 : vector<16x128xi32>
    %c44_i32 = arith.constant 44 : i32
    %110 = vector.broadcast %c44_i32 : i32 to vector<16x128xi32>
    %111 = arith.cmpi slt, %46, %110 : vector<16x128xi32>
    %112 = arith.andi %109, %111 : vector<16x128xi1>
    %113 = arith.negf %107 : vector<16x128xf32>
    %114 = math.exp %113 : vector<16x128xf32>
    %cst_43 = arith.constant 1.000000e+00 : f32
    %115 = vector.broadcast %cst_43 : f32 to vector<16x128xf32>
    %116 = arith.addf %115, %114 : vector<16x128xf32>
    %117 = arith.divf %115, %116 : vector<16x128xf32>
    %cst_44 = arith.constant 0.000000e+00 : f32
    %118 = vector.broadcast %cst_44 : f32 to vector<16x128xf32>
    %119 = arith.select %112, %117, %118 : vector<16x128xi1>, vector<16x128xf32>
    %120 = arith.addf %87, %119 : vector<16x128xf32>
    %c0_45 = arith.constant 0 : index
    %c0_46 = arith.constant 0 : index
    %121 = vector.load %arg10[%c0_45, %c0_46] : memref<16x128xf32, #tpu.memory_space<vmem>>, vector<16x128xf32>
    tpu.vector_store %arg10[%c0_45, %c0_46], %120 {strides = array<i32>} : memref<16x128xf32, #tpu.memory_space<vmem>>, vector<16x128xf32>,
    return
  }
  func.func @transform_0(%arg0: i32) -> (i32, i32) {
    %c0_i32 = arith.constant 0 : i32
    %c0_i32_0 = arith.constant 0 : i32
    return %arg0, %c0_i32 : i32, i32
  }
  func.func @transform_1(%arg0: i32) -> (i32, i32) {
    %c0_i32 = arith.constant 0 : i32
    %c0_i32_0 = arith.constant 0 : i32
    %c0_i32_1 = arith.constant 0 : i32
    return %c0_i32, %c0_i32_0 : i32, i32
  }
  func.func @transform_2(%arg0: i32) -> (i32, i32) {
    %c0_i32 = arith.constant 0 : i32
    %c0_i32_0 = arith.constant 0 : i32
    %c0_i32_1 = arith.constant 0 : i32
    return %c0_i32, %c0_i32_0 : i32, i32
  }
  func.func @transform_3(%arg0: i32) -> (i32, i32) {
    %c0_i32 = arith.constant 0 : i32
    %c0_i32_0 = arith.constant 0 : i32
    %c0_i32_1 = arith.constant 0 : i32
    return %c0_i32, %c0_i32_0 : i32, i32
  }
  func.func @transform_4(%arg0: i32) -> (i32, i32) {
    %c0_i32 = arith.constant 0 : i32
    %c0_i32_0 = arith.constant 0 : i32
    %c0_i32_1 = arith.constant 0 : i32
    return %c0_i32, %c0_i32_0 : i32, i32
  }
  func.func @transform_5(%arg0: i32) -> (i32, i32) {
    %c0_i32 = arith.constant 0 : i32
    %c0_i32_0 = arith.constant 0 : i32
    %c0_i32_1 = arith.constant 0 : i32
    return %c0_i32, %c0_i32_0 : i32, i32
  }
  func.func @transform_6(%arg0: i32) -> (i32, i32) {
    %c0_i32 = arith.constant 0 : i32
    %c0_i32_0 = arith.constant 0 : i32
    %c0_i32_1 = arith.constant 0 : i32
    return %c0_i32, %c0_i32_0 : i32, i32
  }
  func.func @transform_7(%arg0: i32) -> (i32, i32) {
    %c0_i32 = arith.constant 0 : i32
    %c0_i32_0 = arith.constant 0 : i32
    %c0_i32_1 = arith.constant 0 : i32
    return %c0_i32, %c0_i32_0 : i32, i32
  }
  func.func @transform_8(%arg0: i32) -> (i32, i32) {
    %c0_i32 = arith.constant 0 : i32
    %c0_i32_0 = arith.constant 0 : i32
    %c0_i32_1 = arith.constant 0 : i32
    return %c0_i32, %c0_i32_0 : i32, i32
  }
  func.func @transform_9(%arg0: i32) -> (i32, i32) {
    %c0_i32 = arith.constant 0 : i32
    %c0_i32_0 = arith.constant 0 : i32
    return %arg0, %c0_i32 : i32, i32
  }
}

</mosaic_0001>

<bundles_post_ra>
// kernel: tpu_custom_call.1
= control target key start
LH: loop header
LB: loop body
LE: loop exit
PB: predicated region body
PF: predicated region fallthrough
CT: control target
= control target key end

     0   :  { %14 = vsyncpa [#allocation3], 0  ;;  %s1970_s0 = inlined_call_operand.hbm [shape: f32[16,128], index: 0, kind: input, shape index: {}]   ;;  %s1971_s1 = inlined_call_operand.hbm [shape: bf16[128,256], index: 1, kind: input, shape index: {}]   ;;  %s1972_s2 = inlined_call_operand.vmem [shape: f32[1,256], index: 2, kind: input, shape index: {}]   ;;  %s1973_s3 = inlined_call_operand.hbm [shape: bf16[256,256], index: 3, kind: input, shape index: {}]   ;;  %s1974_s4 = inlined_call_operand.vmem [shape: f32[1,256], index: 4, kind: input, shape index: {}]   ;;  %s1975_s5 = inlined_call_operand.hbm [shape: bf16[256,384], index: 5, kind: input, shape index: {}]   ;;  %s1976_s6 = inlined_call_operand.vmem [shape: f32[1,384], index: 6, kind: input, shape index: {}]   ;;  %s1977_s7 = inlined_call_operand.hbm [shape: bf16[256,128], index: 7, kind: input, shape index: {}]   ;;  %s1978_s8 = inlined_call_operand.vmem [shape: f32[1,128], index: 8, kind: input, shape index: {}]   ;;  %s1979_s9 = inlined_call_operand.hbm [shape: f32[16,128], index: 9, kind: output, shape index: {}]  }
   0x1   :  { %15 = vsyncpa [#allocation6], 0 }
   0x2   :  { %16 = vsyncpa [#allocation9], 0 }
   0x3   :  { %17 = vsyncpa [#allocation4], 0  ;;  %s1799_s30 = smov [#allocation5]   ;;  %s1800_s11 = smov [#allocation8]  }
   0x4   :  { %s35_s10 = sshll.u32 %s1799_s30, 4  ;;  %s63_s12 = sshll.u32 %s1800_s11, 4  ;;  %s36_s10 = int_to_ptr.vmem [resolvable:$true] %s35_s10  ;;  %s64_s12 = int_to_ptr.vmem [resolvable:$true] %s63_s12 }
   0x5   :  { %s1679_s13 = scalar_lea.vmem %s36_s10, 2048  ;;  %p1684_p1 = scmp.lt.s32.totalorder %s36_s10, %s36_s10 }
   0x6   :  { %p1680_p0 = scmp.ne.s32.totalorder %s36_s10, %s1679_s13  ;;  %p1685_p2 = scmp.lt.s32.totalorder %s1679_s13, %s1679_s13 }
   0x8   :  { %p1686_p3 = por %p1685_p2, %p1684_p1 }
   0xa   :  { %p1687_p4 = pnand %p1686_p3, %p1680_p0 }
   0xc   :  { %1690 = shalt.err (!%p1687_p4)
}
   0xd   :  { %s1801_s14 = smov 128   ;;  %s1802_s15 = smov 8  }
   0xe   :  { %41 = dma.hbm_to_vmem [thread:$0]  %s1971_s1, 2048, %s36_s10, [#allocation6], %s1801_s14, %s1801_s14, %s1802_s15  }
   0xf   :  { %s1699_s18 = scalar_lea.vmem %s64_s12, 6144  ;;  %p1704_p6 = scmp.lt.s32.totalorder %s64_s12, %s64_s12 }
  0x10   :  { %p1700_p5 = scmp.ne.s32.totalorder %s64_s12, %s1699_s18  ;;  %p1705_p7 = scmp.lt.s32.totalorder %s1699_s18, %s1699_s18 }
  0x12   :  { %p1706_p8 = por %p1705_p7, %p1704_p6 }
  0x14   :  { %p1707_p9 = pnand %p1706_p8, %p1700_p5 }
  0x16   :  { %1710 = shalt.err (!%p1707_p9)
}
  0x17   :  { %s1803_s19 = smov 192   ;;  %s1804_s20 = smov 12  }
  0x18   :  { %69 = dma.hbm_to_vmem [thread:$0]  %s1975_s5, 6144, %s64_s12, [#allocation9], %s1803_s19, %s1803_s19, %s1804_s20  }
  0x19   :  { %s1805_s23 = smov [#allocation2]   ;;  %s1806_s25 = smov [#allocation7]  }
  0x1a   :  { %s23_s24 = sshll.u32 %s1805_s23, 4  ;;  %s49_s26 = sshll.u32 %s1806_s25, 4  ;;  %s24_s24 = int_to_ptr.vmem [resolvable:$true] %s23_s24  ;;  %s50_s26 = int_to_ptr.vmem [resolvable:$true] %s49_s26 }
  0x1b   :  { %s1719_s1 = scalar_lea.vmem %s24_s24, 256  ;;  %p1724_p11 = scmp.lt.s32.totalorder %s24_s24, %s24_s24 }
  0x1c   :  { %p1720_p10 = scmp.ne.s32.totalorder %s24_s24, %s1719_s1  ;;  %p1725_p12 = scmp.lt.s32.totalorder %s1719_s1, %s1719_s1 }
  0x1e   :  { %p1726_p13 = por %p1725_p12, %p1724_p11 }
  0x20   :  { %p1727_p0 = pnand %p1726_p13, %p1720_p10 }
  0x22   :  { %1730 = shalt.err (!%p1727_p0)
}
  0x23   :  { %29 = dma.hbm_to_vmem [thread:$0]  %s1970_s0, 256, %s24_s24, [#allocation3], %s1801_s14, %s1801_s14, %s1802_s15  }
  0x24   :  { %s1739_s5 = scalar_lea.vmem %s50_s26, 4096  ;;  %p1744_p2 = scmp.lt.s32.totalorder %s50_s26, %s50_s26 }
  0x25   :  { %p1740_p1 = scmp.ne.s32.totalorder %s50_s26, %s1739_s5  ;;  %p1745_p3 = scmp.lt.s32.totalorder %s1739_s5, %s1739_s5 }
  0x27   :  { %p1746_p4 = por %p1745_p3, %p1744_p2 }
  0x29   :  { %p1747_p5 = pnand %p1746_p4, %p1740_p1 }
  0x2b   :  { %1750 = shalt.err (!%p1747_p5)
}
  0x2c   :  { %55 = dma.hbm_to_vmem [thread:$0]  %s1973_s3, 4096, %s50_s26, [#allocation6], %s1801_s14, %s1801_s14, %s1802_s15  }
  0x2d   :  { %s1807_s10 = smov [#allocation10]  }
  0x2e   :  { %s77_s11 = sshll.u32 %s1807_s10, 4  ;;  %s78_s11 = int_to_ptr.vmem [resolvable:$true] %s77_s11 }
  0x2f   :  { %s1759_s12 = scalar_lea.vmem %s78_s11, 2048  ;;  %p1764_p7 = scmp.lt.s32.totalorder %s78_s11, %s78_s11 }
  0x30   :  { %p1760_p6 = scmp.ne.s32.totalorder %s78_s11, %s1759_s12  ;;  %p1765_p8 = scmp.lt.s32.totalorder %s1759_s12, %s1759_s12 }
  0x32   :  { %p1766_p9 = por %p1765_p8, %p1764_p7 }
  0x34   :  { %p1767_p10 = pnand %p1766_p9, %p1760_p6 }
  0x36   :  { %1770 = shalt.err (!%p1767_p10)
}
  0x37   :  { %s1808_s0 = smov 64   ;;  %s1809_s13 = smov 4  }
  0x38   :  { %83 = dma.hbm_to_vmem [thread:$0]  %s1977_s7, 2048, %s78_s11, [#allocation9], %s1808_s0, %s1808_s0, %s1809_s13  }
  0x39   :  { %1791 = dma.done.wait [#allocation3], 256  }
  0x3a   :  { %1792 = vsyncadd [#allocation3], 4294967040 }
  0x3b   :  { %1793 = dma.done.wait [#allocation6], 6144  }
  0x3c   :  { %1794 = vsyncadd [#allocation6], 4294961152 }
  0x3d   :  { %1795 = dma.done.wait [#allocation9], 8192  }
  0x3e   :  { %1796 = vsyncadd [#allocation9], 4294959104  ;;  %v1810_v0 = vmov 0   ;;  %v1475_v1 = vld [vmem:[#allocation5 + $0x74] ss:$8 sps:$4 sm:$0xff]  }
  0x3f   :  { %245 = vmatprep.mubr.bf16.mxu0 %v1810_v0  ;;  %v1477_v2 = vld [vmem:[#allocation5 + $0x70] ss:$8 sps:$4 sm:$0xff]   ;;  %213 = vmatprep.subr.bf16.mxu0 %v1475_v1  ;;  %v1478_v3 = vld [vmem:[#allocation5 + $0x64] ss:$8 sps:$4 sm:$0xff]   ;;  %v1480_v4 = vld [vmem:[#allocation5 + $0x60] ss:$8 sps:$4 sm:$0xff]   ;;  %v123_v0 = vlaneseq }
  0x40   :  { %214 = vmatpush1.bf16.msra.mxu0 %v1477_v2  ;;  %v1481_v5 = vld [vmem:[#allocation5 + $0x54] ss:$8 sps:$4 sm:$0xff]   ;;  %v1483_v6 = vld [vmem:[#allocation5 + $0x50] ss:$8 sps:$4 sm:$0xff]   ;;  %v1484_v7 = vld [vmem:[#allocation5 + $0x44] ss:$8 sps:$4 sm:$0xff]  }
  0x41   :  { %215 = vmatprep.subr.bf16.mxu0 %v1478_v3  ;;  %v1486_v8 = vld [vmem:[#allocation5 + $0x40] ss:$8 sps:$4 sm:$0xff]   ;;  %v1487_v9 = vld [vmem:[#allocation5 + $0x34] ss:$8 sps:$4 sm:$0xff]   ;;  %v1501_v11 = vld [vmem:[#allocation7 + $0x70] ss:$8 sps:$4 sm:$0xff]  }
  0x42   :  { %v1499_v10 = vld [vmem:[#allocation7 + $0x74] ss:$8 sps:$4 sm:$0xff]   ;;  %v1502_v12 = vld [vmem:[#allocation7 + $0x64] ss:$8 sps:$4 sm:$0xff]   ;;  %v1489_v13 = vld [vmem:[#allocation5 + $0x30] ss:$8 sps:$4 sm:$0xff]  }
  0x43   :  { %498 = vmatprep.subr.bf16.mxu1 %v1499_v10  ;;  %v1504_v14 = vld [vmem:[#allocation7 + $0x60] ss:$8 sps:$4 sm:$0xff]   ;;  %v1490_v15 = vld [vmem:[#allocation5 + $0x24] ss:$8 sps:$4 sm:$0xff]   ;;  %v1505_v16 = vld [vmem:[#allocation7 + $0x54] ss:$8 sps:$4 sm:$0xff]  }
  0x44   :  { %216 = vmatpush1.bf16.msra.mxu0 %v1480_v4  ;;  %499 = vmatpush1.bf16.msra.mxu1 %v1501_v11  ;;  %v1492_v17 = vld [vmem:[#allocation5 + $0x20] ss:$8 sps:$4 sm:$0xff]   ;;  %v1493_v18 = vld [vmem:[#allocation5 + $0x14] ss:$8 sps:$4 sm:$0xff]   ;;  %v1507_v19 = vld [vmem:[#allocation7 + $0x50] ss:$8 sps:$4 sm:$0xff]  }
  0x45   :  { %217 = vmatprep.subr.bf16.mxu0 %v1481_v5  ;;  %500 = vmatprep.subr.bf16.mxu1 %v1502_v12  ;;  %v1508_v20 = vld [vmem:[#allocation7 + $0x44] ss:$8 sps:$4 sm:$0xff]   ;;  %v1495_v21 = vld [vmem:[#allocation5 + $0x10] ss:$8 sps:$4 sm:$0xff]   ;;  %v1510_v22 = vld [vmem:[#allocation7 + $0x40] ss:$8 sps:$4 sm:$0xff]  }
  0x46   :  { %v1496_v23 = vld [vmem:[#allocation5 + $0x4] ss:$8 sps:$4 sm:$0xff]   ;;  %v1511_v24 = vld [vmem:[#allocation7 + $0x34] ss:$8 sps:$4 sm:$0xff]   ;;  %v1498_v25 = vld [vmem:[#allocation5] ss:$8 sps:$4 sm:$0xff]  }
  0x47   :  { %v102_v26 = vld [vmem:[#allocation2] sm:$0xff]  ;;  %v103_v27 = vld [vmem:[#allocation2 + $0x8] sm:$0xff]  ;;  %v1514_v29 = vld [vmem:[#allocation7 + $0x24] ss:$8 sps:$4 sm:$0xff]   ;;  %v1887_v1 = vshrl.u32 %v123_v0, 7 }
  0x48   :  { %218 = vmatpush1.bf16.msra.mxu0 %v1483_v6  ;;  %501 = vmatpush1.bf16.msra.mxu1 %v1504_v14  ;;  %v1513_v28 = vld [vmem:[#allocation7 + $0x30] ss:$8 sps:$4 sm:$0xff]   ;;  %v1516_v30 = vld [vmem:[#allocation7 + $0x20] ss:$8 sps:$4 sm:$0xff]   ;;  %v104_v31 = vpack.c.bf16 %v103_v27, %v102_v26  ;;  %v1517_v32 = vld [vmem:[#allocation7 + $0x14] ss:$8 sps:$4 sm:$0xff]  }
  0x49   :  { %219 = vmatprep.subr.bf16.mxu0 %v1484_v7  ;;  %502 = vmatprep.subr.bf16.mxu1 %v1505_v16  ;;  %v1519_v33 = vld [vmem:[#allocation7 + $0x10] ss:$8 sps:$4 sm:$0xff]   ;;  %v1520_v34 = vld [vmem:[#allocation7 + $0x4] ss:$8 sps:$4 sm:$0xff]   ;;  %v1522_v35 = vld [vmem:[#allocation7] ss:$8 sps:$4 sm:$0xff]  }
  0x4a   :  { %v1523_v36 = vld [vmem:[#allocation7 + $0xf4] ss:$8 sps:$4 sm:$0xff]   ;;  %v1525_v37 = vld [vmem:[#allocation7 + $0xf0] ss:$8 sps:$4 sm:$0xff]   ;;  %v1526_v38 = vld [vmem:[#allocation7 + $0xe4] ss:$8 sps:$4 sm:$0xff]  }
  0x4b   :  { %v1528_v39 = vld [vmem:[#allocation7 + $0xe0] ss:$8 sps:$4 sm:$0xff]   ;;  %v1529_v40 = vld [vmem:[#allocation7 + $0xd4] ss:$8 sps:$4 sm:$0xff]   ;;  %v1531_v41 = vld [vmem:[#allocation7 + $0xd0] ss:$8 sps:$4 sm:$0xff]  }
  0x4c   :  { %220 = vmatpush1.bf16.msra.mxu0 %v1486_v8  ;;  %503 = vmatpush1.bf16.msra.mxu1 %v1507_v19  ;;  %v1532_v42 = vld [vmem:[#allocation7 + $0xc4] ss:$8 sps:$4 sm:$0xff]   ;;  %v1534_v43 = vld [vmem:[#allocation7 + $0xc0] ss:$8 sps:$4 sm:$0xff]   ;;  %v1535_v44 = vld [vmem:[#allocation7 + $0xb4] ss:$8 sps:$4 sm:$0xff]  }
  0x4d   :  { %221 = vmatprep.subr.bf16.mxu0 %v1487_v9  ;;  %504 = vmatprep.subr.bf16.mxu1 %v1508_v20  ;;  %v1537_v45 = vld [vmem:[#allocation7 + $0xb0] ss:$8 sps:$4 sm:$0xff]   ;;  %v1538_v46 = vld [vmem:[#allocation7 + $0xa4] ss:$8 sps:$4 sm:$0xff]   ;;  %v1540_v47 = vld [vmem:[#allocation7 + $0xa0] ss:$8 sps:$4 sm:$0xff]  }
  0x4e   :  { %v1541_v48 = vld [vmem:[#allocation7 + $0x94] ss:$8 sps:$4 sm:$0xff]   ;;  %v1543_v49 = vld [vmem:[#allocation7 + $0x90] ss:$8 sps:$4 sm:$0xff]   ;;  %v1544_v50 = vld [vmem:[#allocation7 + $0x84] ss:$8 sps:$4 sm:$0xff]  }
  0x4f   :  { %v1546_v51 = vld [vmem:[#allocation7 + $0x80] ss:$8 sps:$4 sm:$0xff]   ;;  %v1549_v53 = vld [vmem:[#allocation8 + $0xac] ss:$12 sps:$4 sm:$0xff]   ;;  %v1550_v55 = vld [vmem:[#allocation8 + $0x90] ss:$12 sps:$4 sm:$0xff]  }
  0x50   :  { %222 = vmatpush1.bf16.msra.mxu0 %v1489_v13  ;;  %505 = vmatpush1.bf16.msra.mxu1 %v1510_v22  ;;  %v1547_v52 = vld [vmem:[#allocation8 + $0xa8] ss:$12 sps:$4 sm:$0xff]   ;;  %v1553_v57 = vld [vmem:[#allocation8 + $0x78] ss:$12 sps:$4 sm:$0xff]   ;;  %v1556_v59 = vld [vmem:[#allocation8 + $0x60] ss:$12 sps:$4 sm:$0xff]  }
  0x51   :  { %223 = vmatprep.subr.bf16.mxu0 %v1490_v15  ;;  %506 = vmatprep.subr.bf16.mxu1 %v1511_v24  ;;  %v1552_v54 = vld [vmem:[#allocation8 + $0x94] ss:$12 sps:$4 sm:$0xff]   ;;  %v1555_v56 = vld [vmem:[#allocation8 + $0x7c] ss:$12 sps:$4 sm:$0xff]   ;;  %v1558_v58 = vld [vmem:[#allocation8 + $0x64] ss:$12 sps:$4 sm:$0xff]  }
  0x52   :  { %v1561_v60 = vld [vmem:[#allocation8 + $0x4c] ss:$12 sps:$4 sm:$0xff]   ;;  %v1559_v61 = vld [vmem:[#allocation8 + $0x48] ss:$12 sps:$4 sm:$0xff]   ;;  %v1562_v63 = vld [vmem:[#allocation8 + $0x30] ss:$12 sps:$4 sm:$0xff]  }
  0x53   :  { %v1564_v62 = vld [vmem:[#allocation8 + $0x34] ss:$12 sps:$4 sm:$0xff]   ;;  %v1890_v2 = vsub.s32 0, %v1887_v1  ;;  %v121_v3 = vld [vmem:[%s1972_s2] sm:$0x3]  ;;  %v1896_v4 = vsub.s32 1, %v1887_v1 }
  0x54   :  { %224 = vmatpush1.bf16.msra.mxu0 %v1492_v17  ;;  %507 = vmatpush1.bf16.msra.mxu1 %v1513_v28 }
  0x55   :  { %225 = vmatprep.subr.bf16.mxu0 %v1493_v18  ;;  %508 = vmatprep.subr.bf16.mxu1 %v1514_v29  ;;  %v126_v5 = vrot.slane %v121_v3, %v1890_v2  ;;  %v130_v6 = vrot.slane %v121_v3, %v1896_v4  ;;  %v1580_v3 = vld [vmem:[#allocation8 + $0x98] ss:$12 sps:$4 sm:$0xff]  }
  0x58   :  { %226 = vmatpush1.bf16.msra.mxu0 %v1495_v21  ;;  %509 = vmatpush1.bf16.msra.mxu1 %v1516_v30 }
  0x59   :  { %227 = vmatprep.subr.bf16.mxu0 %v1496_v23  ;;  %510 = vmatprep.subr.bf16.mxu1 %v1517_v32 }
  0x5c   :  { %228 = vmatpush1.bf16.msra.mxu0 %v1498_v25  ;;  %511 = vmatpush1.bf16.msra.mxu1 %v1519_v33 }
  0x5d   :  { %512 = vmatprep.subr.bf16.mxu1 %v1520_v34  ;;  %916 = vmatprep.subr.bf16.mxu0 %v1549_v53  ;;  %v1567_v53 = vld [vmem:[#allocation8 + $0x1c] ss:$12 sps:$4 sm:$0xff]  }
  0x5f   :  { %246 = vmatmul.mubr.bf16.vlgmr.msra.gmra.mxu0 %v104_v31 }
  0x60   :  { %513 = vmatpush1.bf16.msra.mxu1 %v1522_v35  ;;  %917 = vmatpush1.bf16.msra.mxu0 %v1547_v52 }
  0x61   :  { %514 = vmatprep.subr.bf16.mxu1 %v1523_v36  ;;  %918 = vmatprep.subr.bf16.mxu0 %v1552_v54  ;;  %v1565_v54 = vld [vmem:[#allocation8 + $0x18] ss:$12 sps:$4 sm:$0xff]  }
  0x64   :  { %515 = vmatpush2.bf16.msra.mxu1 %v1525_v37  ;;  %919 = vmatpush1.bf16.msra.mxu0 %v1550_v55  ;;  %v1570_v55 = vld [vmem:[#allocation8 + $0x4] ss:$12 sps:$4 sm:$0xff]  }
  0x65   :  { %516 = vmatprep.subr.bf16.mxu1 %v1526_v38  ;;  %920 = vmatprep.subr.bf16.mxu0 %v1555_v56  ;;  %v1568_v56 = vld [vmem:[#allocation8] ss:$12 sps:$4 sm:$0xff]  }
  0x68   :  { %517 = vmatpush2.bf16.msra.mxu1 %v1528_v39  ;;  %921 = vmatpush1.bf16.msra.mxu0 %v1553_v57  ;;  %v1573_v57 = vld [vmem:[#allocation8 + $0x16c] ss:$12 sps:$4 sm:$0xff]  }
  0x69   :  { %518 = vmatprep.subr.bf16.mxu1 %v1529_v40  ;;  %922 = vmatprep.subr.bf16.mxu0 %v1558_v58  ;;  %v1574_v58 = vld [vmem:[#allocation8 + $0x170] ss:$12 sps:$4 sm:$0xff]  }
  0x6c   :  { %519 = vmatpush2.bf16.msra.mxu1 %v1531_v41  ;;  %923 = vmatpush1.bf16.msra.mxu0 %v1556_v59  ;;  %v1571_v59 = vld [vmem:[#allocation8 + $0x168] ss:$12 sps:$4 sm:$0xff]  }
  0x6d   :  { %520 = vmatprep.subr.bf16.mxu1 %v1532_v42  ;;  %924 = vmatprep.subr.bf16.mxu0 %v1561_v60  ;;  %v1575_v60 = vld [vmem:[#allocation8 + $0xb0] ss:$12 sps:$4 sm:$0xff]  }
  0x70   :  { %521 = vmatpush2.bf16.msra.mxu1 %v1534_v43  ;;  %925 = vmatpush1.bf16.msra.mxu0 %v1559_v61  ;;  %v1578_v61 = vld [vmem:[#allocation8 + $0x154] ss:$12 sps:$4 sm:$0xff]  }
  0x71   :  { %522 = vmatprep.subr.bf16.mxu1 %v1535_v44  ;;  %926 = vmatprep.subr.bf16.mxu0 %v1564_v62  ;;  %v1579_v62 = vld [vmem:[#allocation8 + $0x158] ss:$12 sps:$4 sm:$0xff]  }
  0x74   :  { %523 = vmatpush2.bf16.msra.mxu1 %v1537_v45  ;;  %927 = vmatpush1.bf16.msra.mxu0 %v1562_v63  ;;  %v1576_v63 = vld [vmem:[#allocation8 + $0x150] ss:$12 sps:$4 sm:$0xff]  }
  0x75   :  { %524 = vmatprep.subr.bf16.mxu1 %v1538_v46  ;;  %928 = vmatprep.subr.bf16.mxu0 %v1567_v53 }
  0x78   :  { %525 = vmatpush2.bf16.msra.mxu1 %v1540_v47  ;;  %929 = vmatpush1.bf16.msra.mxu0 %v1565_v54 }
  0x79   :  { %526 = vmatprep.subr.bf16.mxu1 %v1541_v48  ;;  %930 = vmatprep.subr.bf16.mxu0 %v1570_v55 }
  0x7c   :  { %527 = vmatpush2.bf16.msra.mxu1 %v1543_v49  ;;  %931 = vmatpush1.bf16.msra.mxu0 %v1568_v56 }
  0x7d   :  { %528 = vmatprep.subr.bf16.mxu1 %v1544_v50  ;;  %932 = vmatprep.subr.bf16.mxu0 %v1573_v57 }
  0x80   :  { %529 = vmatpush2.bf16.msra.mxu1 %v1546_v51  ;;  %933 = vmatpush2.bf16.msra.mxu0 %v1571_v59 }
  0x81   :  { %1418 = vmatprep.subr.bf16.mxu1 %v1574_v58  ;;  %934 = vmatprep.subr.bf16.mxu0 %v1578_v61 }
  0x84   :  { %935 = vmatpush2.bf16.msra.mxu0 %v1576_v63 }
 0x11f   :  { %v247_v7 = vpop.f32.mrf.mxu0 }
 0x120   :  { %v248_v8 = vadd.f32 %v247_v7, %v126_v5  ;;  %v1581_v7 = vld [vmem:[#allocation8 + $0x138] ss:$12 sps:$4 sm:$0xff]  }
 0x121   :  { %v249_v9 = vpop.f32.mrf.mxu0 }
 0x122   :  { %v260_v10 = vmul.f32 0.044715, %v248_v8  ;;  %v250_v11 = vadd.f32 %v249_v9, %v130_v6  ;;  %v256_v46 = vmul.f32 0.5, %v248_v8  ;;  %v1588_v9 = vld [vmem:[#allocation8 + $0x124] ss:$12 sps:$4 sm:$0xff]  }
 0x123   :  { %v251_v12 = vpop.f32.mrf.mxu0 }
 0x124   :  { %v264_v13 = vmul.f32 %v260_v10, %v248_v8  ;;  %v261_v14 = vmul.f32 0.044715, %v250_v11  ;;  %v252_v15 = vadd.f32 %v251_v12, %v126_v5  ;;  %v257_v43 = vmul.f32 0.5, %v250_v11  ;;  %v1583_v5 = vld [vmem:[#allocation8 + $0x13c] ss:$12 sps:$4 sm:$0xff]  }
 0x125   :  { %v253_v16 = vpop.f32.mrf.mxu0  ;;  %936 = vmatprep.subr.bf16.mxu0 %v1583_v5  ;;  %v1589_v10 = vld [vmem:[#allocation8 + $0x128] ss:$12 sps:$4 sm:$0xff]  }
 0x126   :  { %v268_v17 = vmul.f32 %v264_v13, %v248_v8  ;;  %v262_v18 = vmul.f32 0.044715, %v252_v15  ;;  %v254_v19 = vadd.f32 %v253_v16, %v130_v6  ;;  %v265_v20 = vmul.f32 %v261_v14, %v250_v11  ;;  %v1584_v6 = vld [vmem:[#allocation8 + $0x140] ss:$12 sps:$4 sm:$0xff]   ;;  %937 = vmatpush2.bf16.msra.mxu0 %v1581_v7  ;;  %v1590_v12 = vld [vmem:[#allocation8 + $0x68] ss:$12 sps:$4 sm:$0xff]  }
 0x127   :  { %v258_v41 = vmul.f32 0.5, %v252_v15  ;;  %938 = vmatprep.subr.bf16.mxu0 %v1588_v9  ;;  %v1593_v13 = vld [vmem:[#allocation8 + $0x10c] ss:$12 sps:$4 sm:$0xff]   ;;  %v1594_v14 = vld [vmem:[#allocation8 + $0x110] ss:$12 sps:$4 sm:$0xff]  }
 0x128   :  { %v266_v21 = vmul.f32 %v262_v18, %v252_v15  ;;  %v263_v22 = vmul.f32 0.044715, %v254_v19  ;;  %v269_v23 = vmul.f32 %v265_v20, %v250_v11  ;;  %v272_v24 = vadd.f32 %v268_v17, %v248_v8  ;;  %v1585_v8 = vld [vmem:[#allocation8 + $0x80] ss:$12 sps:$4 sm:$0xff]   ;;  %v1595_v16 = vld [vmem:[#allocation8 + $0x50] ss:$12 sps:$4 sm:$0xff]  }
 0x129   :  { %v259_v44 = vmul.f32 0.5, %v254_v19  ;;  %v1598_v17 = vld [vmem:[#allocation8 + $0xf4] ss:$12 sps:$4 sm:$0xff]   ;;  %v1599_v18 = vld [vmem:[#allocation8 + $0xf8] ss:$12 sps:$4 sm:$0xff]  }
 0x12a   :  { %v270_v25 = vmul.f32 %v266_v21, %v252_v15  ;;  %v267_v26 = vmul.f32 %v263_v22, %v254_v19  ;;  %v273_v27 = vadd.f32 %v269_v23, %v250_v11  ;;  %v276_v28 = vmul.f32 0.7978846, %v272_v24  ;;  %v1586_v11 = vld [vmem:[#allocation8 + $0x120] ss:$12 sps:$4 sm:$0xff]   ;;  %v1600_v20 = vld [vmem:[#allocation8 + $0x38] ss:$12 sps:$4 sm:$0xff]  }
 0x12b   :  { %939 = vmatpush2.bf16.msra.mxu0 %v1586_v11  ;;  %v1603_v21 = vld [vmem:[#allocation8 + $0xdc] ss:$12 sps:$4 sm:$0xff]   ;;  %v1604_v22 = vld [vmem:[#allocation8 + $0xe0] ss:$12 sps:$4 sm:$0xff]   ;;  %v1601_v23 = vld [vmem:[#allocation8 + $0xd8] ss:$12 sps:$4 sm:$0xff]  }
 0x12c   :  { %v271_v29 = vmul.f32 %v267_v26, %v254_v19  ;;  %v277_v30 = vmul.f32 0.7978846, %v273_v27  ;;  %v274_v31 = vadd.f32 %v270_v25, %v252_v15  ;;  %v1591_v15 = vld [vmem:[#allocation8 + $0x108] ss:$12 sps:$4 sm:$0xff]   ;;  %940 = vmatprep.subr.bf16.mxu0 %v1593_v13  ;;  %v1605_v24 = vld [vmem:[#allocation8 + $0x20] ss:$12 sps:$4 sm:$0xff]  }
 0x12d   :  { %v1608_v25 = vld [vmem:[#allocation8 + $0xc4] ss:$12 sps:$4 sm:$0xff]   ;;  %v1609_v26 = vld [vmem:[#allocation8 + $0xc8] ss:$12 sps:$4 sm:$0xff]   ;;  %v1606_v27 = vld [vmem:[#allocation8 + $0xc0] ss:$12 sps:$4 sm:$0xff]  }
 0x12e   :  { %v275_v32 = vadd.f32 %v271_v29, %v254_v19  ;;  %1627 = vtanh.f32 %v277_v30  ;;  %v278_v33 = vmul.f32 0.7978846, %v274_v31  ;;  %v1596_v19 = vld [vmem:[#allocation8 + $0xf0] ss:$12 sps:$4 sm:$0xff]  }
 0x12f   :  { %1629 = vtanh.f32 %v276_v28  ;;  %941 = vmatpush2.bf16.msra.mxu0 %v1591_v15  ;;  %v1610_v28 = vld [vmem:[#allocation8 + $0x8] ss:$12 sps:$4 sm:$0xff]   ;;  %v326_v29 = vld [vmem:[%s1974_s4] sm:$0x3] }
 0x130   :  { %v279_v34 = vmul.f32 0.7978846, %v275_v32  ;;  %1631 = vtanh.f32 %v278_v33  ;;  %942 = vmatprep.subr.bf16.mxu0 %v1598_v17  ;;  %v331_v30 = vrot.slane %v326_v29, %v1890_v2  ;;  %v335_v31 = vrot.slane %v326_v29, %v1896_v4  ;;  %v1622_v29 = vld [vmem:[#allocation10 + $0x10] sm:$0xff]  }
 0x132   :  { %1633 = vtanh.f32 %v279_v34 }
 0x133   :  { %943 = vmatpush2.bf16.msra.mxu0 %v1596_v19  ;;  %v1612_v19 = vld [vmem:[#allocation10 + $0x38] sm:$0xff]  }
 0x134   :  { %944 = vmatprep.subr.bf16.mxu0 %v1603_v21  ;;  %v1614_v21 = vld [vmem:[#allocation10 + $0x30] sm:$0xff]  }
 0x137   :  { %945 = vmatpush2.bf16.msra.mxu0 %v1601_v23  ;;  %v1616_v23 = vld [vmem:[#allocation10 + $0x28] sm:$0xff]  }
 0x138   :  { %946 = vmatprep.subr.bf16.mxu0 %v1608_v25  ;;  %v1618_v25 = vld [vmem:[#allocation10 + $0x20] sm:$0xff]  }
 0x13b   :  { %v1628_v35 = vpop.eup %1627  ;;  %947 = vmatpush2.bf16.msra.mxu0 %v1606_v27  ;;  %v1620_v27 = vld [vmem:[#allocation10 + $0x18] sm:$0xff]  }
 0x13c   :  { %v1630_v36 = vpop.eup %1629  ;;  %v285_v38 = vadd.f32 1.0, %v1628_v35 }
 0x13d   :  { %v1632_v37 = vpop.eup %1631  ;;  %v284_v42 = vadd.f32 1.0, %v1630_v36 }
 0x13e   :  { %v286_v39 = vadd.f32 1.0, %v1632_v37  ;;  %v289_v48 = vmul.f32 %v285_v38, %v257_v43 }
 0x13f   :  { %v1634_v40 = vpop.eup %1633  ;;  %v288_v50 = vmul.f32 %v284_v42, %v256_v46 }
 0x140   :  { %v287_v45 = vadd.f32 1.0, %v1634_v40  ;;  %v290_v47 = vmul.f32 %v286_v39, %v258_v41 }
 0x142   :  { %v291_v49 = vmul.f32 %v287_v45, %v259_v44  ;;  %v292_v52 = vpack.c.bf16 %v290_v47, %v288_v50 }
 0x144   :  { %v293_v51 = vpack.c.bf16 %v291_v49, %v289_v48 }
 0x146   :  { %530 = vmatprep.mubr.bf16.mxu1 %v293_v51 }
 0x147   :  { %531 = vmatmul.mubr.bf16.vlgmr.msra.gmra.mxu1 %v292_v52 }
 0x148   :  { %1419 = vmatpush3.bf16.msra.mxu1 %v1575_v60 }
 0x149   :  { %1420 = vmatprep.subr.bf16.mxu1 %v1579_v62 }
 0x14c   :  { %1421 = vmatpush3.bf16.msra.mxu1 %v1580_v3 }
 0x14d   :  { %1422 = vmatprep.subr.bf16.mxu1 %v1584_v6 }
 0x150   :  { %1423 = vmatpush3.bf16.msra.mxu1 %v1585_v8 }
 0x151   :  { %1424 = vmatprep.subr.bf16.mxu1 %v1589_v10 }
 0x154   :  { %1425 = vmatpush3.bf16.msra.mxu1 %v1590_v12 }
 0x155   :  { %1426 = vmatprep.subr.bf16.mxu1 %v1594_v14 }
 0x158   :  { %1427 = vmatpush3.bf16.msra.mxu1 %v1595_v16 }
 0x159   :  { %1428 = vmatprep.subr.bf16.mxu1 %v1599_v18  ;;  %v1611_v18 = vld [vmem:[#allocation10 + $0x78] sm:$0xff]  }
 0x15a   :  { %1440 = vmatprep.subr.bf16.mxu0 %v1611_v18 }
 0x15c   :  { %1429 = vmatpush3.bf16.msra.mxu1 %v1600_v20  ;;  %v1613_v20 = vld [vmem:[#allocation10 + $0x70] sm:$0xff]  }
 0x15d   :  { %1430 = vmatprep.subr.bf16.mxu1 %v1604_v22  ;;  %v1615_v22 = vld [vmem:[#allocation10 + $0x68] sm:$0xff]  }
 0x160   :  { %1431 = vmatpush3.bf16.msra.mxu1 %v1605_v24  ;;  %v1617_v24 = vld [vmem:[#allocation10 + $0x60] sm:$0xff]  }
 0x161   :  { %1432 = vmatprep.subr.bf16.mxu1 %v1609_v26  ;;  %v1619_v26 = vld [vmem:[#allocation10 + $0x58] sm:$0xff]  }
 0x164   :  { %1433 = vmatpush3.bf16.msra.mxu1 %v1610_v28  ;;  %v1621_v28 = vld [vmem:[#allocation10 + $0x50] sm:$0xff]  }
 0x207   :  { %v532_v32 = vpop.f32.mrf.mxu1 }
 0x208   :  { %v533_v33 = vadd.f32 %v532_v32, %v331_v30  ;;  %v1625_v32 = vld [vmem:[#allocation10 + $0x40] sm:$0xff]  }
 0x209   :  { %v534_v34 = vpop.f32.mrf.mxu1 }
 0x20a   :  { %v545_v35 = vmul.f32 0.044715, %v533_v33  ;;  %v535_v36 = vadd.f32 %v534_v34, %v335_v31  ;;  %v541_v11 = vmul.f32 0.5, %v533_v33  ;;  %v1906_v34 = vand.u32 127, %v123_v0 }
 0x20b   :  { %v536_v37 = vpop.f32.mrf.mxu1 }
 0x20c   :  { %v549_v38 = vmul.f32 %v545_v35, %v533_v33  ;;  %v546_v39 = vmul.f32 0.044715, %v535_v36  ;;  %v537_v40 = vadd.f32 %v536_v37, %v331_v30  ;;  %v542_v8 = vmul.f32 0.5, %v535_v36  ;;  %v1623_v30 = vld [vmem:[#allocation10 + $0x48] sm:$0xff]   ;;  %v643_v35 = vld [vmem:[%s1976_s6] sm:$0x7] }
 0x20d   :  { %v538_v41 = vpop.f32.mrf.mxu1  ;;  %v655_v37 = vsub.s32 2, %v1887_v1  ;;  %vm1003_vm0 = vcmp.ge.s32.totalorder %v1906_v34, 38  ;;  %vm1004_vm1 = vcmp.lt.s32.totalorder %v1906_v34, 42  ;;  %vm1002_vm3 = vcmp.lt.s32.totalorder %v1906_v34, 38 }
 0x20e   :  { %v553_v42 = vmul.f32 %v549_v38, %v533_v33  ;;  %v550_v43 = vmul.f32 %v546_v39, %v535_v36  ;;  %v547_v44 = vmul.f32 0.044715, %v537_v40  ;;  %v539_v45 = vadd.f32 %v538_v41, %v335_v31  ;;  %v1624_v31 = vld [vmem:[#allocation10 + $0x8] sm:$0xff]   ;;  %vm1916_vm2 = vmand %vm1003_vm0, %vm1004_vm1 }
 0x20f   :  { %v543_v6 = vmul.f32 0.5, %v537_v40  ;;  %v652_v38 = vrot.slane %v643_v35, %v1896_v4  ;;  %vm1020_vm4 = vmor %vm1002_vm3, %vm1916_vm2  ;;  %vm1263_vm5 = vcmp.ge.s32.totalorder %v1906_v34, 42  ;;  %vm1264_vm6 = vcmp.lt.s32.totalorder %v1906_v34, 44 }
 0x210   :  { %v557_v46 = vadd.f32 %v553_v42, %v533_v33  ;;  %v554_v47 = vmul.f32 %v550_v43, %v535_v36  ;;  %v551_v48 = vmul.f32 %v547_v44, %v537_v40  ;;  %v548_v49 = vmul.f32 0.044715, %v539_v45  ;;  %v1626_v33 = vld [vmem:[#allocation10] sm:$0xff]   ;;  %vm1265_vm7 = vmand %vm1263_vm5, %vm1264_vm6 }
 0x211   :  { %v544_v9 = vmul.f32 0.5, %v539_v45  ;;  %v656_v42 = vrot.slane %v643_v35, %v655_v37 }
 0x212   :  { %v555_v50 = vmul.f32 %v551_v48, %v537_v40  ;;  %v552_v51 = vmul.f32 %v548_v49, %v539_v45  ;;  %v558_v52 = vadd.f32 %v554_v47, %v535_v36  ;;  %v561_v53 = vmul.f32 0.7978846, %v557_v46 }
 0x213   :  { %v648_v36 = vrot.slane %v643_v35, %v1890_v2 }
 0x214   :  { %v559_v54 = vadd.f32 %v555_v50, %v537_v40  ;;  %v556_v55 = vmul.f32 %v552_v51, %v539_v45  ;;  %v562_v56 = vmul.f32 0.7978846, %v558_v52 }
 0x216   :  { %v563_v57 = vmul.f32 0.7978846, %v559_v54  ;;  %v560_v58 = vadd.f32 %v556_v55, %v539_v45  ;;  %1635 = vtanh.f32 %v562_v56 }
 0x217   :  { %1637 = vtanh.f32 %v561_v53 }
 0x218   :  { %1639 = vtanh.f32 %v563_v57  ;;  %v564_v59 = vmul.f32 0.7978846, %v560_v58 }
 0x21a   :  { %1641 = vtanh.f32 %v564_v59 }
 0x223   :  { %v1636_v60 = vpop.eup %1635 }
 0x224   :  { %v1638_v61 = vpop.eup %1637  ;;  %v570_v63 = vadd.f32 1.0, %v1636_v60 }
 0x225   :  { %v1640_v62 = vpop.eup %1639  ;;  %v569_v7 = vadd.f32 1.0, %v1638_v61 }
 0x226   :  { %v571_v3 = vadd.f32 1.0, %v1640_v62  ;;  %v574_v13 = vmul.f32 %v570_v63, %v542_v8 }
 0x227   :  { %v1642_v5 = vpop.eup %1641  ;;  %v573_v15 = vmul.f32 %v569_v7, %v541_v11 }
 0x228   :  { %v572_v10 = vadd.f32 1.0, %v1642_v5  ;;  %v575_v12 = vmul.f32 %v571_v3, %v543_v6 }
 0x22a   :  { %v576_v14 = vmul.f32 %v572_v10, %v544_v9  ;;  %v577_v17 = vpack.c.bf16 %v575_v12, %v573_v15 }
 0x22c   :  { %v578_v16 = vpack.c.bf16 %v576_v14, %v574_v13 }
 0x22e   :  { %948 = vmatprep.mubr.bf16.mxu0 %v578_v16  ;;  %991 = vmatprep.mubr.bf16.mxu1 %v578_v16 }
 0x22f   :  { %949 = vmatmul.mubr.bf16.vlgmr.msra.gmra.mxu0 %v577_v17  ;;  %992 = vmatmul.mubr.bf16.vlgmr.msra.gmra.mxu1 %v577_v17 }
 0x230   :  { %1441 = vmatpush3.bf16.msra.mxu0 %v1612_v19 }
 0x231   :  { %1442 = vmatprep.subr.bf16.mxu0 %v1613_v20 }
 0x234   :  { %1443 = vmatpush3.bf16.msra.mxu0 %v1614_v21 }
 0x235   :  { %1444 = vmatprep.subr.bf16.mxu0 %v1615_v22 }
 0x238   :  { %1445 = vmatpush3.bf16.msra.mxu0 %v1616_v23 }
 0x239   :  { %1446 = vmatprep.subr.bf16.mxu0 %v1617_v24 }
 0x23c   :  { %1447 = vmatpush3.bf16.msra.mxu0 %v1618_v25 }
 0x23d   :  { %1448 = vmatprep.subr.bf16.mxu0 %v1619_v26 }
 0x240   :  { %1449 = vmatpush3.bf16.msra.mxu0 %v1620_v27 }
 0x241   :  { %1450 = vmatprep.subr.bf16.mxu0 %v1621_v28 }
 0x244   :  { %1451 = vmatpush3.bf16.msra.mxu0 %v1622_v29 }
 0x245   :  { %1452 = vmatprep.subr.bf16.mxu0 %v1623_v30 }
 0x248   :  { %1453 = vmatpush3.bf16.msra.mxu0 %v1624_v31 }
 0x249   :  { %1454 = vmatprep.subr.bf16.mxu0 %v1625_v32 }
 0x24c   :  { %1455 = vmatpush3.bf16.msra.mxu0 %v1626_v33 }
 0x2ef   :  { %v950_v39 = vpop.f32.mrf.mxu0  ;;  %v1434_v40 = vpop.f32.mrf.mxu1 }
 0x2f0   :  { %v1921_v0 = vadd.f32 %v950_v39, %v648_v36 }
 0x2f1   :  { %v952_v2 = vpop.f32.mrf.mxu0  ;;  %v1435_v43 = vpop.f32.mrf.mxu1 }
 0x2f2   :  { %v953_v1 = vadd.f32 %v952_v2, %v652_v38  ;;  %v1436_v44 = vadd.f32 %v1435_v43, %v1434_v40  ;;  %v1012_v45 = vsel %vm1916_vm2, %v1921_v0, -1e+30  ;;  %v1006_v4 = vsel %vm1002_vm3, %v1921_v0, -1e+30 }
 0x2f3   :  { %v954_v46 = vpop.f32.mrf.mxu0  ;;  %v1437_v47 = vpop.f32.mrf.mxu1  ;;  %1014 = vmax.xlane.f32.xlu1 %v1012_v45  ;;  %1008 = vmax.xlane.f32.xlu0 %v1006_v4 }
 0x2f4   :  { %v1053_v48 = vmul.f32 0.044715, %v953_v1  ;;  %v994_v49 = vadd.f32 %v1436_v44, %v656_v42  ;;  %v1929_v50 = vadd.f32 %v954_v46, %v648_v36  ;;  %v1049_v28 = vmul.f32 0.5, %v953_v1 }
 0x2f5   :  { %v956_v51 = vpop.f32.mrf.mxu0  ;;  %v1438_v52 = vpop.f32.mrf.mxu1 }
 0x2f6   :  { %v1057_v53 = vmul.f32 %v1053_v48, %v953_v1  ;;  %v1054_v54 = vmul.f32 0.044715, %v994_v49  ;;  %v957_v55 = vadd.f32 %v956_v51, %v652_v38  ;;  %v1439_v56 = vadd.f32 %v1438_v52, %v1437_v47 }
 0x2f7   :  { %v1013_v57 = vsel %vm1916_vm2, %v1929_v50, -1e+30  ;;  %v1007_v58 = vsel %vm1002_vm3, %v1929_v50, -1e+30  ;;  %v1050_v25 = vmul.f32 0.5, %v994_v49 }
 0x2f8   :  { %v1061_v59 = vmul.f32 %v1057_v53, %v953_v1  ;;  %v1058_v60 = vmul.f32 %v1054_v54, %v994_v49  ;;  %v1055_v61 = vmul.f32 0.044715, %v957_v55  ;;  %v997_v62 = vadd.f32 %v1439_v56, %v656_v42  ;;  %1016 = vmax.xlane.f32.xlu1 %v1013_v57  ;;  %1010 = vmax.xlane.f32.xlu0 %v1007_v58 }
 0x2f9   :  { %v1051_v23 = vmul.f32 0.5, %v957_v55 }
 0x2fa   :  { %v1065_v63 = vadd.f32 %v1061_v59, %v953_v1  ;;  %v1059_v3 = vmul.f32 %v1055_v61, %v957_v55  ;;  %v1056_v5 = vmul.f32 0.044715, %v997_v62  ;;  %v1062_v6 = vmul.f32 %v1058_v60, %v994_v49 }
 0x2fb   :  { %v1052_v26 = vmul.f32 0.5, %v997_v62 }
 0x2fc   :  { %v1069_v7 = vmul.f32 0.7978846, %v1065_v63  ;;  %v1063_v8 = vmul.f32 %v1059_v3, %v957_v55  ;;  %v1060_v9 = vmul.f32 %v1056_v5, %v997_v62  ;;  %v1066_v10 = vadd.f32 %v1062_v6, %v994_v49 }
 0x2fe   :  { %v1067_v11 = vadd.f32 %v1063_v8, %v957_v55  ;;  %v1064_v12 = vmul.f32 %v1060_v9, %v997_v62  ;;  %v1070_v13 = vmul.f32 0.7978846, %v1066_v10  ;;  %1643 = vtanh.f32 %v1069_v7  ;;  %v1399_v55 = vld [vmem:[%s1978_s8] ss:$0 sm:$0xff]  ;;  %s1811_s8 = smov [#allocation11]  }
 0x2ff   :  { %s1289_s21 = sshll.u32 %s1811_s8, 4  ;;  %s1290_s21 = int_to_ptr.vmem [resolvable:$true] %s1289_s21 }
 0x300   :  { %v1071_v14 = vmul.f32 0.7978846, %v1067_v11  ;;  %v1068_v15 = vadd.f32 %v1064_v12, %v997_v62  ;;  %1645 = vtanh.f32 %v1070_v13  ;;  %s1771_s22 = scalar_lea.vmem %s1290_s21, 256  ;;  %p1776_p12 = scmp.lt.s32.totalorder %s1290_s21, %s1290_s21 }
 0x301   :  { %p1772_p11 = scmp.ne.s32.totalorder %s1290_s21, %s1771_s22  ;;  %p1777_p13 = scmp.lt.s32.totalorder %s1771_s22, %s1771_s22 }
 0x302   :  { %1647 = vtanh.f32 %v1071_v14  ;;  %v1072_v16 = vmul.f32 0.7978846, %v1068_v15 }
 0x303   :  { %p1778_p0 = por %p1777_p13, %p1776_p12 }
 0x304   :  { %1649 = vtanh.f32 %v1072_v16 }
 0x305   :  { %p1779_p1 = pnand %p1778_p0, %p1772_p11 }
 0x30b   :  { %v1644_v17 = vpop.eup %1643 }
 0x30c   :  { %v1077_v24 = vadd.f32 1.0, %v1644_v17 }
 0x30d   :  { %v1646_v18 = vpop.eup %1645 }
 0x30e   :  { %v1078_v20 = vadd.f32 1.0, %v1646_v18  ;;  %v1081_v32 = vmul.f32 %v1077_v24, %v1049_v28 }
 0x30f   :  { %v1648_v19 = vpop.eup %1647 }
 0x310   :  { %v1079_v21 = vadd.f32 1.0, %v1648_v19  ;;  %v1082_v30 = vmul.f32 %v1078_v20, %v1050_v25 }
 0x311   :  { %v1650_v22 = vpop.eup %1649 }
 0x312   :  { %v1080_v27 = vadd.f32 1.0, %v1650_v22  ;;  %v1083_v29 = vmul.f32 %v1079_v21, %v1051_v23 }
 0x314   :  { %v1084_v31 = vmul.f32 %v1080_v27, %v1052_v26  ;;  %v1085_v35 = vpack.c.bf16 %v1083_v29, %v1081_v32 }
 0x316   :  { %v1086_v33 = vpack.c.bf16 %v1084_v31, %v1082_v30 }
 0x318   :  { %1254 = vmatprep.mubr.bf16.mxu0 %v1086_v33 }
 0x319   :  { %1255 = vmatmul.mubr.bf16.vlgmr.msra.gmra.mxu0 %v1085_v35 }
 0x37c   :  { %v1015_v36 = vpop.xlane.xlu1 %1014  ;;  %v1009_v37 = vpop.xlane.xlu0 %1008 }
 0x37d   :  { %v1018_v38 = vsel %vm1002_vm3, %v1009_v37, %v1015_v36 }
 0x37e   :  { %v1021_v39 = vsub.f32 %v1921_v0, %v1018_v38 }
 0x380   :  { %v1023_v40 = vsel %vm1020_vm4, %v1021_v39, -1e+30 }
 0x381   :  { %v1025_v42 = vmul.f32 1.442695, %v1023_v40  ;;  %v1017_v2 = vpop.xlane.xlu1 %1016  ;;  %v1011_v43 = vpop.xlane.xlu0 %1010 }
 0x382   :  { %v1019_v1 = vsel %vm1002_vm3, %v1011_v43, %v1017_v2 }
 0x383   :  { %1651 = vpow2.f32 %v1025_v42  ;;  %v1022_v44 = vsub.f32 %v1929_v50, %v1019_v1 }
 0x385   :  { %v1024_v45 = vsel %vm1020_vm4, %v1022_v44, -1e+30 }
 0x386   :  { %v1027_v4 = vmul.f32 1.442695, %v1024_v45 }
 0x388   :  { %1653 = vpow2.f32 %v1027_v4 }
 0x390   :  { %v1652_v46 = vpop.eup %1651 }
 0x391   :  { %v1029_v47 = vsel %vm1002_vm3, %v1652_v46, 0.0  ;;  %v1035_v0 = vsel %vm1916_vm2, %v1652_v46, 0.0 }
 0x392   :  { %1031 = vadd.xlane.f32.xlu0 %v1029_v47 }
 0x395   :  { %v1654_v48 = vpop.eup %1653 }
 0x396   :  { %1037 = vadd.xlane.f32.xlu0 %v1035_v0  ;;  %v1030_v49 = vsel %vm1002_vm3, %v1654_v48, 0.0  ;;  %v1036_v50 = vsel %vm1916_vm2, %v1654_v48, 0.0 }
 0x397   :  { %1033 = vadd.xlane.f32.xlu1 %v1030_v49 }
 0x39b   :  { %1039 = vadd.xlane.f32.xlu1 %v1036_v50 }
 0x3d9   :  { %v1456_v51 = vpop.f32.mrf.mxu0 }
 0x3db   :  { %v1457_v52 = vpop.f32.mrf.mxu0 }
 0x3dc   :  { %v1458_v54 = vadd.f32 %v1457_v52, %v1456_v51 }
 0x3dd   :  { %v1459_v53 = vpop.f32.mrf.mxu0 }
 0x3de   :  { %v1257_v57 = vadd.f32 %v1458_v54, %v1399_v55 }
 0x3df   :  { %v1460_v56 = vpop.f32.mrf.mxu0 }
 0x3e0   :  { %v1461_v58 = vadd.f32 %v1460_v56, %v1459_v53  ;;  %v1416_v59 = vmul.f32 -1.442695, %v1257_v57 }
 0x3e2   :  { %v1260_v60 = vadd.f32 %v1461_v58, %v1399_v55  ;;  %1655 = vpow2.f32 %v1416_v59 }
 0x3e4   :  { %v1417_v61 = vmul.f32 -1.442695, %v1260_v60 }
 0x3e6   :  { %1657 = vpow2.f32 %v1417_v61 }
 0x3ef   :  { %v1656_v62 = vpop.eup %1655 }
 0x3f0   :  { %v1272_v41 = vadd.f32 1.0, %v1656_v62 }
 0x3f2   :  { %1659 = vrcp.f32 %v1272_v41 }
 0x3f3   :  { %v1658_v3 = vpop.eup %1657 }
 0x3f4   :  { %v1273_v5 = vadd.f32 1.0, %v1658_v3 }
 0x3ff   :  { %v1660_v9 = vpop.eup %1659 }
 0x400   :  { %v1278_v15 = vsel %vm1265_vm7, %v1660_v9, 0.0 }
 0x41b   :  { %v1032_v63 = vpop.xlane.xlu0 %1031 }
 0x41c   :  { %1661 = vrcp.f32 %v1032_v63 }
 0x41f   :  { %v1038_v6 = vpop.xlane.xlu0 %1037 }
 0x420   :  { %v1034_v7 = vpop.xlane.xlu1 %1033  ;;  %1663 = vrcp.f32 %v1038_v6 }
 0x421   :  { %1665 = vrcp.f32 %v1273_v5 }
 0x422   :  { %1667 = vrcp.f32 %v1034_v7 }
 0x424   :  { %v1040_v8 = vpop.xlane.xlu1 %1039 }
 0x425   :  { %1669 = vrcp.f32 %v1040_v8 }
 0x429   :  { %v1662_v10 = vpop.eup %1661 }
 0x42d   :  { %v1664_v11 = vpop.eup %1663 }
 0x42e   :  { %v1045_v12 = vsel %vm1002_vm3, %v1662_v10, %v1664_v11  ;;  %v1666_v14 = vpop.eup %1665 }
 0x42f   :  { %v1047_v13 = vmul.f32 %v1652_v46, %v1045_v12  ;;  %v1668_v16 = vpop.eup %1667  ;;  %v1279_v21 = vsel %vm1265_vm7, %v1666_v14, 0.0 }
 0x431   :  { %v1280_v17 = vadd.f32 %v1278_v15, %v1047_v13 }
 0x432   :  { %v1670_v18 = vpop.eup %1669 }
 0x433   :  { %v1046_v19 = vsel %vm1002_vm3, %v1668_v16, %v1670_v18  ;;  %1282 = vst [vmem:[#allocation11] sm:$0xff] %v1280_v17 }
 0x434   :  { %v1048_v20 = vmul.f32 %v1654_v48, %v1046_v19 }
 0x436   :  { %v1281_v22 = vadd.f32 %v1279_v21, %v1048_v20 }
 0x438   :  { %1283 = vst [vmem:[#allocation11 + $0x8] sm:$0xff] %v1281_v22 }
 0x439   :  { %1782 = shalt.err (!%p1779_p1)
}
 0x43a   :  { %1295 = dma.vmem_to_hbm [thread:$0]  %s1290_s21, 256, %s1979_s9, [#allocation4], %s1801_s14, %s1801_s14, %s1802_s15  }
 0x43b   :  { %1797 = dma.done.wait [#allocation4], 256  }
 0x43c   :  { %1798 = vsyncadd [#allocation4], 4294967040 }
 0x43d   :  { %1299 = vsyncpa [#allocation3], 1 }
 0x43e   :  { %1300 = vsyncpa [#allocation6], 1 }
 0x43f   :  { %1301 = vsyncpa [#allocation9], 1 }
 0x440   :  { %1302 = vsyncpa [#allocation4], 1 }

</bundles_post_ra>
